<compile_context>
chip_gen: v7x
topology: tpu7x:2x2x1
jax: 0.10.0
libtpu: 0.0.40
codegen_flags: <defaults>
</compile_context>

<pallas_src>
import functools

import jax
import jax.numpy as jnp
from jax.experimental import pallas as pl
from jax.experimental.pallas import tpu as pltpu


# ----------------------------------------------------------------------------
# Generic tiled linear kernel: out = x @ w + b
# Used for (a) the hoisted LSTM input projection and (b) the decoder.
# Grid = (rows, cols, K) with a VMEM f32 accumulator; bias added at last K.
# ----------------------------------------------------------------------------
def _linear_kernel(x_ref, w_ref, b_ref, o_ref, acc_ref):
    k = pl.program_id(2)

    @pl.when(k == 0)
    def _():
        acc_ref[...] = jnp.zeros_like(acc_ref)

    acc_ref[...] += jnp.dot(x_ref[...], w_ref[...],
                            preferred_element_type=jnp.float32)

    @pl.when(k == pl.num_programs(2) - 1)
    def _():
        o_ref[...] = (acc_ref[...] + b_ref[...]).astype(o_ref.dtype)


def _pick_tile(dim, pref, mult):
    """Largest tile <= pref that is a multiple of `mult` and divides `dim`,
    otherwise the full dim (full-extent blocks always satisfy (8,128))."""
    t = (pref // mult) * mult
    while t >= mult:
        if dim % t == 0:
            return t
        t -= mult
    return dim


def linear_pallas(x, w, b):
    """x: (N, K); w: (K, V); b: (V,) -> (N, V) in f32."""
    N, K = x.shape
    V = w.shape[1]
    tm = _pick_tile(N, 256, 8)
    tn = _pick_tile(V, 512, 128)
    tk = _pick_tile(K, 512, 128)
    grid = (N // tm, V // tn, K // tk)
    # TODO(synk): on v6e/v7x cast w (and x) to bf16 for the fast MXU path
    # (keep preferred_element_type=f32 accumulation); kept f32 for exact parity.
    return pl.pallas_call(
        _linear_kernel,
        out_shape=jax.ShapeDtypeStruct((N, V), jnp.float32),
        grid_spec=pltpu.PrefetchScalarGridSpec(
            num_scalar_prefetch=0,
            grid=grid,
            in_specs=[
                pl.BlockSpec((tm, tk), lambda i, j, k: (i, k)),
                pl.BlockSpec((tk, tn), lambda i, j, k: (k, j)),
                pl.BlockSpec((1, tn), lambda i, j, k: (0, j)),
            ],
            out_specs=pl.BlockSpec((tm, tn), lambda i, j, k: (i, j)),
            scratch_shapes=[pltpu.VMEM((tm, tn), jnp.float32)],
        ),
        compiler_params=pltpu.CompilerParams(
            dimension_semantics=("parallel", "parallel", "arbitrary")),
    )(x, w, b.reshape(1, V))


# ----------------------------------------------------------------------------
# LSTM recurrence kernel: chunked time grid, in-kernel fori_loop over steps.
# Each step does only the unavoidable h-dependent matmul: h @ W_hh^T.
# ----------------------------------------------------------------------------
def _lstm_recurrent_kernel(gx_ref, h0_ref, c0_ref, whh_ref,
                           y_ref, hN_ref, cN_ref, h_sc, c_sc):
    ci = pl.program_id(0)

    @pl.when(ci == 0)
    def _():
        h_sc[...] = h0_ref[...]
        c_sc[...] = c0_ref[...]

    chunk_t = gx_ref.shape[0]
    H = h0_ref.shape[-1]

    def sigmoid(z):
        # sigmoid(z) = 0.5 * tanh(z/2) + 0.5 : one EUP push instead of exp+recip.
        return 0.5 * jnp.tanh(0.5 * z) + 0.5

    def step(t, carry):
        h, c = carry
        # gates_x (x @ W_ih^T + b_ih + b_hh) was precomputed as one big GEMM.
        gates = gx_ref[t] + jnp.dot(h, whh_ref[...],
                                    preferred_element_type=jnp.float32)
        # NOTE: at realistic H (multiple of 128) these slices are lane-aligned.
        i = sigmoid(gates[:, 0 * H:1 * H])   # input gate
        f = sigmoid(gates[:, 1 * H:2 * H])   # forget gate
        g = jnp.tanh(gates[:, 2 * H:3 * H])  # cell candidate
        o = sigmoid(gates[:, 3 * H:4 * H])   # output gate
        c_new = f * c + i * g
        h_new = o * jnp.tanh(c_new)
        y_ref[t] = h_new                     # VMEM slab write, flushed per chunk
        return (h_new, c_new)

    h, c = jax.lax.fori_loop(0, chunk_t, step, (h_sc[...], c_sc[...]))
    h_sc[...] = h
    c_sc[...] = c
    hN_ref[...] = h
    cN_ref[...] = c


def _pick_time_chunk(T, B, H, budget_bytes=8 * 1024 * 1024):
    """Largest divisor of T whose gx + y VMEM slabs fit the budget."""
    bytes_per_step = B * (4 * H + H) * 4
    chunk = T
    while chunk > 1 and chunk * bytes_per_step > budget_bytes:
        chunk -= 1
        while chunk > 1 and T % chunk != 0:
            chunk -= 1
    return chunk


def lstm_layer(x, h0, c0, w_ih, w_hh, b_ih, b_hh):
    """One LSTM layer.

    x: (T, B, Din); h0, c0: (B, H); w_ih: (Din, 4H); w_hh: (H, 4H) (pre-transposed).
    """
    T, B, Din = x.shape
    H = h0.shape[-1]

    # (1) Hoisted input projection: one MXU-efficient GEMM over all time steps,
    #     with both biases folded in (no per-step bias broadcast).
    gx = linear_pallas(x.reshape(T * B, Din), w_ih, b_ih + b_hh)
    gx = gx.reshape(T, B, 4 * H)

    # (2) Serial recurrence: chunked time grid + in-kernel fori_loop.
    chunk_t = _pick_time_chunk(T, B, H)
    grid = (T // chunk_t,)

    grid_spec = pltpu.PrefetchScalarGridSpec(
        num_scalar_prefetch=0,
        grid=grid,
        in_specs=[
            pl.BlockSpec((chunk_t, B, 4 * H), lambda c: (c, 0, 0)),
            pl.BlockSpec((B, H), lambda c: (0, 0)),
            pl.BlockSpec((B, H), lambda c: (0, 0)),
            # NOTE: for large H on v7x use pipeline_mode=pl.Buffered(1) here
            # (the weight never changes across chunks) and/or cast to bf16.
            pl.BlockSpec((H, 4 * H), lambda c: (0, 0)),
        ],
        out_specs=[
            pl.BlockSpec((chunk_t, B, H), lambda c: (c, 0, 0)),
            pl.BlockSpec((B, H), lambda c: (0, 0)),
            pl.BlockSpec((B, H), lambda c: (0, 0)),
        ],
        scratch_shapes=[
            pltpu.VMEM((B, H), jnp.float32),   # h carried across chunks
            pltpu.VMEM((B, H), jnp.float32),   # c carried across chunks
        ],
    )

    y, hN, cN = pl.pallas_call(
        _lstm_recurrent_kernel,
        out_shape=(
            jax.ShapeDtypeStruct((T, B, H), jnp.float32),
            jax.ShapeDtypeStruct((B, H), jnp.float32),
            jax.ShapeDtypeStruct((B, H), jnp.float32),
        ),
        grid_spec=grid_spec,
        compiler_params=pltpu.CompilerParams(
            dimension_semantics=("arbitrary",)),   # sequential recurrence
    )(gx, h0, c0, w_hh)
    return y, hN, cN


# ----------------------------------------------------------------------------
# Full model forward (glue in plain JAX, hot path in Pallas).
# ----------------------------------------------------------------------------
def init_params(key, n_token, n_inp, n_hidden, n_layers):
    initrange = 0.05
    keys = jax.random.split(key, 2 + 4 * n_layers)
    params = {
        "encoder": jax.random.uniform(keys[0], (n_token, n_inp), jnp.float32,
                                      -initrange, initrange),
        # Decoder weight stored pre-transposed as (H, V)  (PyTorch keeps (V, H)).
        "dec_w": jax.random.uniform(keys[1], (n_hidden, n_token), jnp.float32,
                                    -initrange, initrange),
        "dec_b": jnp.zeros((n_token,), jnp.float32),
    }
    stdv = 1.0 / float(n_hidden) ** 0.5
    for l in range(n_layers):
        din = n_inp if l == 0 else n_hidden
        k = keys[2 + 4 * l: 2 + 4 * (l + 1)]
        # LSTM weights stored pre-transposed: W_ih^T (Din,4H), W_hh^T (H,4H),
        # avoiding a full-weight XLA transpose + HBM copy every forward.
        params[f"w_ih_{l}"] = jax.random.uniform(
            k[0], (din, 4 * n_hidden), jnp.float32, -stdv, stdv)
        params[f"w_hh_{l}"] = jax.random.uniform(
            k[1], (n_hidden, 4 * n_hidden), jnp.float32, -stdv, stdv)
        params[f"b_ih_{l}"] = jax.random.uniform(
            k[2], (4 * n_hidden,), jnp.float32, -stdv, stdv)
        params[f"b_hh_{l}"] = jax.random.uniform(
            k[3], (4 * n_hidden,), jnp.float32, -stdv, stdv)
    return params


def rnn_model_forward(params, tokens, hidden, n_layers):
    h0, c0 = hidden                              # each (L, B, H)
    emb = params["encoder"][tokens]              # (T, B, n_inp)  (gather = glue)
    x = emb                                      # dropout == identity (eval)
    h_out, c_out = [], []
    for l in range(n_layers):
        y, hN, cN = lstm_layer(
            x, h0[l], c0[l],
            params[f"w_ih_{l}"], params[f"w_hh_{l}"],
            params[f"b_ih_{l}"], params[f"b_hh_{l}"])
        x = y                                    # inter-layer dropout == identity
        h_out.append(hN)
        c_out.append(cN)
    T, B, H = x.shape
    decoded = linear_pallas(x.reshape(T * B, H), params["dec_w"],
                            params["dec_b"])
    return decoded, (jnp.stack(h_out), jnp.stack(c_out))


# ----------------------------------------------------------------------------
# Pure-JAX reference (for correctness check).
# ----------------------------------------------------------------------------
def _lstm_layer_ref(x, h0, c0, w_ih, w_hh, b_ih, b_hh):
    H = h0.shape[-1]

    def step(carry, xt):
        h, c = carry
        g = xt @ w_ih + h @ w_hh + b_ih + b_hh
        i = jax.nn.sigmoid(g[:, :H])
        f = jax.nn.sigmoid(g[:, H:2 * H])
        gg = jnp.tanh(g[:, 2 * H:3 * H])
        o = jax.nn.sigmoid(g[:, 3 * H:])
        c = f * c + i * gg
        h = o * jnp.tanh(c)
        return (h, c), h

    (hN, cN), ys = jax.lax.scan(step, (h0, c0), x)
    return ys, hN, cN


def rnn_model_ref(params, tokens, hidden, n_layers):
    h0, c0 = hidden
    x = params["encoder"][tokens]
    h_out, c_out = [], []
    for l in range(n_layers):
        x, hN, cN = _lstm_layer_ref(
            x, h0[l], c0[l],
            params[f"w_ih_{l}"], params[f"w_hh_{l}"],
            params[f"b_ih_{l}"], params[f"b_hh_{l}"])
        h_out.append(hN)
        c_out.append(cN)
    T, B, H = x.shape
    decoded = x.reshape(T * B, H) @ params["dec_w"] + params["dec_b"]
    return decoded, (jnp.stack(h_out), jnp.stack(c_out))


if __name__ == "__main__":
    n_token, n_inp, n_hidden, n_layers = 32, 16, 32, 2
    seq_len, batch = 8, 4

    key = jax.random.PRNGKey(0)
    pkey, tkey = jax.random.split(key)
    params = init_params(pkey, n_token, n_inp, n_hidden, n_layers)

    tokens = jax.random.randint(tkey, (seq_len, batch), 0, n_token,
                                dtype=jnp.int32)
    hidden = (jnp.zeros((n_layers, batch, n_hidden), jnp.float32),
              jnp.zeros((n_layers, batch, n_hidden), jnp.float32))

    fwd = jax.jit(functools.partial(rnn_model_forward, n_layers=n_layers))
    decoded, (hN, cN) = fwd(params, tokens, hidden)
    jax.block_until_ready(decoded)
    jax.block_until_ready(hN)
    jax.block_until_ready(cN)

    # Sanity check against pure-JAX reference.
    dec_ref, (h_ref, c_ref) = rnn_model_ref(params, tokens, hidden, n_layers)
    assert decoded.shape == (seq_len * batch, n_token)
    assert hN.shape == (n_layers, batch, n_hidden)
    assert jnp.allclose(decoded, dec_ref, atol=1e-5)
    assert jnp.allclose(hN, h_ref, atol=1e-5)
    assert jnp.allclose(cN, c_ref, atol=1e-5)

    print("KERNEL_OK")
</pallas_src>

<mosaic_0001>
module attributes {stable_mosaic.version = 11 : i64} {
  func.func @_linear_kernel(%arg0: i32, %arg1: i32, %arg2: i32, %arg3: memref<32x16xf32, #tpu.memory_space<vmem>>, %arg4: memref<16x128xf32, #tpu.memory_space<vmem>>, %arg5: memref<1x128xf32, #tpu.memory_space<vmem>>, %arg6: memref<32x128xf32, #tpu.memory_space<vmem>>, %arg7: memref<32x128xf32, #tpu.memory_space<vmem>>) attributes {dimension_semantics = [#tpu.dimension_semantics<parallel>, #tpu.dimension_semantics<parallel>, #tpu.dimension_semantics<arbitrary>], iteration_bounds = array<i64: 1, 1, 1>, scalar_prefetch = 0 : i64, scratch_operands = 1 : i64, tpu.core_type = #tpu.core_type<tc>, window_params = [{transform_indices = @transform_0, window_bounds = array<i64: 32, 16>}, {transform_indices = @transform_1, window_bounds = array<i64: 16, 128>}, {transform_indices = @transform_2, window_bounds = array<i64: 1, 128>}, {transform_indices = @transform_3, window_bounds = array<i64: 32, 128>}]} {
    %c0_i32 = arith.constant 0 : i32
    %0 = arith.cmpi eq, %arg2, %c0_i32 : i32
    %1 = arith.extui %0 : i1 to i32
    %c0_i32_0 = arith.constant 0 : i32
    %2 = arith.cmpi ne, %1, %c0_i32_0 : i32
    scf.if %2 {
      %cst_10 = arith.constant 0.000000e+00 : f32
      %12 = vector.broadcast %cst_10 : f32 to vector<32x128xf32>
      %c0_11 = arith.constant 0 : index
      %c0_12 = arith.constant 0 : index
      %13 = vector.load %arg7[%c0_11, %c0_12] : memref<32x128xf32, #tpu.memory_space<vmem>>, vector<32x128xf32>
      tpu.vector_store %arg7[%c0_11, %c0_12], %12 {strides = array<i32>} : memref<32x128xf32, #tpu.memory_space<vmem>>, vector<32x128xf32>,
    } else {
    }
    %c0 = arith.constant 0 : index
    %c0_1 = arith.constant 0 : index
    %3 = vector.load %arg7[%c0, %c0_1] : memref<32x128xf32, #tpu.memory_space<vmem>>, vector<32x128xf32>
    %c0_2 = arith.constant 0 : index
    %c0_3 = arith.constant 0 : index
    %4 = vector.load %arg3[%c0_2, %c0_3] : memref<32x16xf32, #tpu.memory_space<vmem>>, vector<32x16xf32>
    %c0_4 = arith.constant 0 : index
    %c0_5 = arith.constant 0 : index
    %5 = vector.load %arg4[%c0_4, %c0_5] : memref<16x128xf32, #tpu.memory_space<vmem>>, vector<16x128xf32>
    %cst = arith.constant dense<0.000000e+00> : vector<32x128xf32>
    %6 = tpu.matmul %4, %5, %cst {dimension_numbers = #tpu.dot_dimension_numbers<[1], [0], [0], [1], [0, 0, 1, 1], [], []>} : vector<32x16xf32>, vector<16x128xf32>, vector<32x128xf32> -> vector<32x128xf32>
    %7 = arith.addf %3, %6 : vector<32x128xf32>
    %c0_6 = arith.constant 0 : index
    %c0_7 = arith.constant 0 : index
    %8 = vector.load %arg7[%c0_6, %c0_7] : memref<32x128xf32, #tpu.memory_space<vmem>>, vector<32x128xf32>
    tpu.vector_store %arg7[%c0_6, %c0_7], %7 {strides = array<i32>} : memref<32x128xf32, #tpu.memory_space<vmem>>, vector<32x128xf32>,
    %c0_i32_8 = arith.constant 0 : i32
    %9 = arith.cmpi eq, %arg2, %c0_i32_8 : i32
    %10 = arith.extui %9 : i1 to i32
    %c0_i32_9 = arith.constant 0 : i32
    %11 = arith.cmpi ne, %10, %c0_i32_9 : i32
    scf.if %11 {
      %c0_10 = arith.constant 0 : index
      %c0_11 = arith.constant 0 : index
      %12 = vector.load %arg7[%c0_10, %c0_11] : memref<32x128xf32, #tpu.memory_space<vmem>>, vector<32x128xf32>
      %c0_12 = arith.constant 0 : index
      %c0_13 = arith.constant 0 : index
      %13 = vector.load %arg5[%c0_12, %c0_13] : memref<1x128xf32, #tpu.memory_space<vmem>>, vector<1x128xf32>
      %14 = vector.broadcast %13 : vector<1x128xf32> to vector<32x128xf32>
      %15 = arith.addf %12, %14 : vector<32x128xf32>
      %c0_14 = arith.constant 0 : index
      %c0_15 = arith.constant 0 : index
      %16 = vector.load %arg6[%c0_14, %c0_15] : memref<32x128xf32, #tpu.memory_space<vmem>>, vector<32x128xf32>
      tpu.vector_store %arg6[%c0_14, %c0_15], %15 {strides = array<i32>} : memref<32x128xf32, #tpu.memory_space<vmem>>, vector<32x128xf32>,
    } else {
    }
    return
  }
  func.func @transform_0(%arg0: i32, %arg1: i32, %arg2: i32) -> (i32, i32) {
    %c0_i32 = arith.constant 0 : i32
    return %arg0, %arg2 : i32, i32
  }
  func.func @transform_1(%arg0: i32, %arg1: i32, %arg2: i32) -> (i32, i32) {
    %c0_i32 = arith.constant 0 : i32
    return %arg2, %arg1 : i32, i32
  }
  func.func @transform_2(%arg0: i32, %arg1: i32, %arg2: i32) -> (i32, i32) {
    %c0_i32 = arith.constant 0 : i32
    %c0_i32_0 = arith.constant 0 : i32
    return %c0_i32, %arg1 : i32, i32
  }
  func.func @transform_3(%arg0: i32, %arg1: i32, %arg2: i32) -> (i32, i32) {
    %c0_i32 = arith.constant 0 : i32
    return %arg0, %arg1 : i32, i32
  }
}

module attributes {stable_mosaic.version = 11 : i64} {
  func.func @_linear_kernel(%arg0: i32, %arg1: i32, %arg2: i32, %arg3: memref<32x32xf32, #tpu.memory_space<vmem>>, %arg4: memref<32x128xf32, #tpu.memory_space<vmem>>, %arg5: memref<1x128xf32, #tpu.memory_space<vmem>>, %arg6: memref<32x128xf32, #tpu.memory_space<vmem>>, %arg7: memref<32x128xf32, #tpu.memory_space<vmem>>) attributes {dimension_semantics = [#tpu.dimension_semantics<parallel>, #tpu.dimension_semantics<parallel>, #tpu.dimension_semantics<arbitrary>], iteration_bounds = array<i64: 1, 1, 1>, scalar_prefetch = 0 : i64, scratch_operands = 1 : i64, tpu.core_type = #tpu.core_type<tc>, window_params = [{transform_indices = @transform_0, window_bounds = array<i64: 32, 32>}, {transform_indices = @transform_1, window_bounds = array<i64: 32, 128>}, {transform_indices = @transform_2, window_bounds = array<i64: 1, 128>}, {transform_indices = @transform_3, window_bounds = array<i64: 32, 128>}]} {
    %c0_i32 = arith.constant 0 : i32
    %0 = arith.cmpi eq, %arg2, %c0_i32 : i32
    %1 = arith.extui %0 : i1 to i32
    %c0_i32_0 = arith.constant 0 : i32
    %2 = arith.cmpi ne, %1, %c0_i32_0 : i32
    scf.if %2 {
      %cst_10 = arith.constant 0.000000e+00 : f32
      %12 = vector.broadcast %cst_10 : f32 to vector<32x128xf32>
      %c0_11 = arith.constant 0 : index
      %c0_12 = arith.constant 0 : index
      %13 = vector.load %arg7[%c0_11, %c0_12] : memref<32x128xf32, #tpu.memory_space<vmem>>, vector<32x128xf32>
      tpu.vector_store %arg7[%c0_11, %c0_12], %12 {strides = array<i32>} : memref<32x128xf32, #tpu.memory_space<vmem>>, vector<32x128xf32>,
    } else {
    }
    %c0 = arith.constant 0 : index
    %c0_1 = arith.constant 0 : index
    %3 = vector.load %arg7[%c0, %c0_1] : memref<32x128xf32, #tpu.memory_space<vmem>>, vector<32x128xf32>
    %c0_2 = arith.constant 0 : index
    %c0_3 = arith.constant 0 : index
    %4 = vector.load %arg3[%c0_2, %c0_3] : memref<32x32xf32, #tpu.memory_space<vmem>>, vector<32x32xf32>
    %c0_4 = arith.constant 0 : index
    %c0_5 = arith.constant 0 : index
    %5 = vector.load %arg4[%c0_4, %c0_5] : memref<32x128xf32, #tpu.memory_space<vmem>>, vector<32x128xf32>
    %cst = arith.constant dense<0.000000e+00> : vector<32x128xf32>
    %6 = tpu.matmul %4, %5, %cst {dimension_numbers = #tpu.dot_dimension_numbers<[1], [0], [0], [1], [0, 0, 1, 1], [], []>} : vector<32x32xf32>, vector<32x128xf32>, vector<32x128xf32> -> vector<32x128xf32>
    %7 = arith.addf %3, %6 : vector<32x128xf32>
    %c0_6 = arith.constant 0 : index
    %c0_7 = arith.constant 0 : index
    %8 = vector.load %arg7[%c0_6, %c0_7] : memref<32x128xf32, #tpu.memory_space<vmem>>, vector<32x128xf32>
    tpu.vector_store %arg7[%c0_6, %c0_7], %7 {strides = array<i32>} : memref<32x128xf32, #tpu.memory_space<vmem>>, vector<32x128xf32>,
    %c0_i32_8 = arith.constant 0 : i32
    %9 = arith.cmpi eq, %arg2, %c0_i32_8 : i32
    %10 = arith.extui %9 : i1 to i32
    %c0_i32_9 = arith.constant 0 : i32
    %11 = arith.cmpi ne, %10, %c0_i32_9 : i32
    scf.if %11 {
      %c0_10 = arith.constant 0 : index
      %c0_11 = arith.constant 0 : index
      %12 = vector.load %arg7[%c0_10, %c0_11] : memref<32x128xf32, #tpu.memory_space<vmem>>, vector<32x128xf32>
      %c0_12 = arith.constant 0 : index
      %c0_13 = arith.constant 0 : index
      %13 = vector.load %arg5[%c0_12, %c0_13] : memref<1x128xf32, #tpu.memory_space<vmem>>, vector<1x128xf32>
      %14 = vector.broadcast %13 : vector<1x128xf32> to vector<32x128xf32>
      %15 = arith.addf %12, %14 : vector<32x128xf32>
      %c0_14 = arith.constant 0 : index
      %c0_15 = arith.constant 0 : index
      %16 = vector.load %arg6[%c0_14, %c0_15] : memref<32x128xf32, #tpu.memory_space<vmem>>, vector<32x128xf32>
      tpu.vector_store %arg6[%c0_14, %c0_15], %15 {strides = array<i32>} : memref<32x128xf32, #tpu.memory_space<vmem>>, vector<32x128xf32>,
    } else {
    }
    return
  }
  func.func @transform_0(%arg0: i32, %arg1: i32, %arg2: i32) -> (i32, i32) {
    %c0_i32 = arith.constant 0 : i32
    return %arg0, %arg2 : i32, i32
  }
  func.func @transform_1(%arg0: i32, %arg1: i32, %arg2: i32) -> (i32, i32) {
    %c0_i32 = arith.constant 0 : i32
    return %arg2, %arg1 : i32, i32
  }
  func.func @transform_2(%arg0: i32, %arg1: i32, %arg2: i32) -> (i32, i32) {
    %c0_i32 = arith.constant 0 : i32
    %c0_i32_0 = arith.constant 0 : i32
    return %c0_i32, %arg1 : i32, i32
  }
  func.func @transform_3(%arg0: i32, %arg1: i32, %arg2: i32) -> (i32, i32) {
    %c0_i32 = arith.constant 0 : i32
    return %arg0, %arg1 : i32, i32
  }
}

module attributes {stable_mosaic.version = 11 : i64} {
  func.func @_lstm_recurrent_kernel(%arg0: i32, %arg1: memref<8x4x128xf32, #tpu.memory_space<vmem>>, %arg2: memref<4x32xf32, #tpu.memory_space<vmem>>, %arg3: memref<4x32xf32, #tpu.memory_space<vmem>>, %arg4: memref<32x128xf32, #tpu.memory_space<vmem>>, %arg5: memref<8x4x32xf32, #tpu.memory_space<vmem>>, %arg6: memref<4x32xf32, #tpu.memory_space<vmem>>, %arg7: memref<4x32xf32, #tpu.memory_space<vmem>>, %arg8: memref<4x32xf32, #tpu.memory_space<vmem>>, %arg9: memref<4x32xf32, #tpu.memory_space<vmem>>) attributes {dimension_semantics = [#tpu.dimension_semantics<arbitrary>], iteration_bounds = array<i64: 1>, scalar_prefetch = 0 : i64, scratch_operands = 2 : i64, tpu.core_type = #tpu.core_type<tc>, window_params = [{transform_indices = @transform_0, window_bounds = array<i64: 8, 4, 128>}, {pipeline_mode = #tpu.pipeline_mode<synchronous>, transform_indices = @transform_1, window_bounds = array<i64: 4, 32>}, {pipeline_mode = #tpu.pipeline_mode<synchronous>, transform_indices = @transform_2, window_bounds = array<i64: 4, 32>}, {pipeline_mode = #tpu.pipeline_mode<synchronous>, transform_indices = @transform_3, window_bounds = array<i64: 32, 128>}, {transform_indices = @transform_4, window_bounds = array<i64: 8, 4, 32>}, {pipeline_mode = #tpu.pipeline_mode<synchronous>, transform_indices = @transform_5, window_bounds = array<i64: 4, 32>}, {pipeline_mode = #tpu.pipeline_mode<synchronous>, transform_indices = @transform_6, window_bounds = array<i64: 4, 32>}]} {
    %c0_i32 = arith.constant 0 : i32
    %0 = arith.cmpi eq, %arg0, %c0_i32 : i32
    %1 = arith.extui %0 : i1 to i32
    %c0_i32_0 = arith.constant 0 : i32
    %2 = arith.cmpi ne, %1, %c0_i32_0 : i32
    scf.if %2 {
      %c0_14 = arith.constant 0 : index
      %c0_15 = arith.constant 0 : index
      %11 = vector.load %arg2[%c0_14, %c0_15] : memref<4x32xf32, #tpu.memory_space<vmem>>, vector<4x32xf32>
      %c0_16 = arith.constant 0 : index
      %c0_17 = arith.constant 0 : index
      %12 = vector.load %arg8[%c0_16, %c0_17] : memref<4x32xf32, #tpu.memory_space<vmem>>, vector<4x32xf32>
      tpu.vector_store %arg8[%c0_16, %c0_17], %11 {strides = array<i32>} : memref<4x32xf32, #tpu.memory_space<vmem>>, vector<4x32xf32>,
      %c0_18 = arith.constant 0 : index
      %c0_19 = arith.constant 0 : index
      %13 = vector.load %arg3[%c0_18, %c0_19] : memref<4x32xf32, #tpu.memory_space<vmem>>, vector<4x32xf32>
      %c0_20 = arith.constant 0 : index
      %c0_21 = arith.constant 0 : index
      %14 = vector.load %arg9[%c0_20, %c0_21] : memref<4x32xf32, #tpu.memory_space<vmem>>, vector<4x32xf32>
      tpu.vector_store %arg9[%c0_20, %c0_21], %13 {strides = array<i32>} : memref<4x32xf32, #tpu.memory_space<vmem>>, vector<4x32xf32>,
    } else {
    }
    %c0 = arith.constant 0 : index
    %c0_1 = arith.constant 0 : index
    %3 = vector.load %arg8[%c0, %c0_1] : memref<4x32xf32, #tpu.memory_space<vmem>>, vector<4x32xf32>
    %c0_2 = arith.constant 0 : index
    %c0_3 = arith.constant 0 : index
    %4 = vector.load %arg9[%c0_2, %c0_3] : memref<4x32xf32, #tpu.memory_space<vmem>>, vector<4x32xf32>
    %c0_i32_4 = arith.constant 0 : i32
    %c8_i32 = arith.constant 8 : i32
    %5 = arith.addi %c0_i32_4, %c8_i32 : i32
    %c1_i32 = arith.constant 1 : i32
    %6:2 = scf.for %arg10 = %c0_i32_4 to %5 step %c1_i32 iter_args(%arg11 = %3, %arg12 = %4) -> (vector<4x32xf32>, vector<4x32xf32>)  : i32 {
      %11 = arith.index_cast %arg10 : i32 to index
      %c0_14 = arith.constant 0 : index
      %c0_15 = arith.constant 0 : index
      %12 = vector.load %arg1[%11, %c0_14, %c0_15] : memref<8x4x128xf32, #tpu.memory_space<vmem>>, vector<1x4x128xf32>
      %13 = vector.shape_cast %12 : vector<1x4x128xf32> to vector<4x128xf32>
      %c0_16 = arith.constant 0 : index
      %c0_17 = arith.constant 0 : index
      %14 = vector.load %arg4[%c0_16, %c0_17] : memref<32x128xf32, #tpu.memory_space<vmem>>, vector<32x128xf32>
      %cst = arith.constant dense<0.000000e+00> : vector<4x128xf32>
      %15 = tpu.matmul %arg11, %14, %cst {dimension_numbers = #tpu.dot_dimension_numbers<[1], [0], [0], [1], [0, 0, 1, 1], [], []>} : vector<4x32xf32>, vector<32x128xf32>, vector<4x128xf32> -> vector<4x128xf32>
      %16 = arith.addf %13, %15 : vector<4x128xf32>
      %17 = vector.extract_strided_slice %16 {offsets = [0, 0], sizes = [4, 32], strides = [1, 1]} : vector<4x128xf32> to vector<4x32xf32>
      %cst_18 = arith.constant 5.000000e-01 : f32
      %18 = vector.broadcast %cst_18 : f32 to vector<4x32xf32>
      %19 = arith.mulf %18, %17 : vector<4x32xf32>
      %20 = math.tanh %19 : vector<4x32xf32>
      %cst_19 = arith.constant 5.000000e-01 : f32
      %21 = vector.broadcast %cst_19 : f32 to vector<4x32xf32>
      %22 = arith.mulf %21, %20 : vector<4x32xf32>
      %cst_20 = arith.constant 5.000000e-01 : f32
      %23 = vector.broadcast %cst_20 : f32 to vector<4x32xf32>
      %24 = arith.addf %22, %23 : vector<4x32xf32>
      %25 = vector.extract_strided_slice %16 {offsets = [0, 32], sizes = [4, 32], strides = [1, 1]} : vector<4x128xf32> to vector<4x32xf32>
      %cst_21 = arith.constant 5.000000e-01 : f32
      %26 = vector.broadcast %cst_21 : f32 to vector<4x32xf32>
      %27 = arith.mulf %26, %25 : vector<4x32xf32>
      %28 = math.tanh %27 : vector<4x32xf32>
      %cst_22 = arith.constant 5.000000e-01 : f32
      %29 = vector.broadcast %cst_22 : f32 to vector<4x32xf32>
      %30 = arith.mulf %29, %28 : vector<4x32xf32>
      %cst_23 = arith.constant 5.000000e-01 : f32
      %31 = vector.broadcast %cst_23 : f32 to vector<4x32xf32>
      %32 = arith.addf %30, %31 : vector<4x32xf32>
      %33 = vector.extract_strided_slice %16 {offsets = [0, 64], sizes = [4, 32], strides = [1, 1]} : vector<4x128xf32> to vector<4x32xf32>
      %34 = math.tanh %33 : vector<4x32xf32>
      %35 = vector.extract_strided_slice %16 {offsets = [0, 96], sizes = [4, 32], strides = [1, 1]} : vector<4x128xf32> to vector<4x32xf32>
      %cst_24 = arith.constant 5.000000e-01 : f32
      %36 = vector.broadcast %cst_24 : f32 to vector<4x32xf32>
      %37 = arith.mulf %36, %35 : vector<4x32xf32>
      %38 = math.tanh %37 : vector<4x32xf32>
      %cst_25 = arith.constant 5.000000e-01 : f32
      %39 = vector.broadcast %cst_25 : f32 to vector<4x32xf32>
      %40 = arith.mulf %39, %38 : vector<4x32xf32>
      %cst_26 = arith.constant 5.000000e-01 : f32
      %41 = vector.broadcast %cst_26 : f32 to vector<4x32xf32>
      %42 = arith.addf %40, %41 : vector<4x32xf32>
      %43 = arith.mulf %32, %arg12 : vector<4x32xf32>
      %44 = arith.mulf %24, %34 : vector<4x32xf32>
      %45 = arith.addf %43, %44 : vector<4x32xf32>
      %46 = math.tanh %45 : vector<4x32xf32>
      %47 = arith.mulf %42, %46 : vector<4x32xf32>
      %48 = arith.index_cast %arg10 : i32 to index
      %c0_27 = arith.constant 0 : index
      %c0_28 = arith.constant 0 : index
      %49 = vector.load %arg5[%48, %c0_27, %c0_28] : memref<8x4x32xf32, #tpu.memory_space<vmem>>, vector<1x4x32xf32>
      %50 = vector.shape_cast %49 : vector<1x4x32xf32> to vector<4x32xf32>
      %51 = vector.shape_cast %47 : vector<4x32xf32> to vector<1x4x32xf32>
      tpu.vector_store %arg5[%48, %c0_27, %c0_28], %51 {strides = array<i32>} : memref<8x4x32xf32, #tpu.memory_space<vmem>>, vector<1x4x32xf32>,
      scf.yield %47, %45 : vector<4x32xf32>, vector<4x32xf32>
    }
    %c8_i32_5 = arith.constant 8 : i32
    %c0_6 = arith.constant 0 : index
    %c0_7 = arith.constant 0 : index
    %7 = vector.load %arg8[%c0_6, %c0_7] : memref<4x32xf32, #tpu.memory_space<vmem>>, vector<4x32xf32>
    tpu.vector_store %arg8[%c0_6, %c0_7], %6#0 {strides = array<i32>} : memref<4x32xf32, #tpu.memory_space<vmem>>, vector<4x32xf32>,
    %c0_8 = arith.constant 0 : index
    %c0_9 = arith.constant 0 : index
    %8 = vector.load %arg9[%c0_8, %c0_9] : memref<4x32xf32, #tpu.memory_space<vmem>>, vector<4x32xf32>
    tpu.vector_store %arg9[%c0_8, %c0_9], %6#1 {strides = array<i32>} : memref<4x32xf32, #tpu.memory_space<vmem>>, vector<4x32xf32>,
    %c0_10 = arith.constant 0 : index
    %c0_11 = arith.constant 0 : index
    %9 = vector.load %arg6[%c0_10, %c0_11] : memref<4x32xf32, #tpu.memory_space<vmem>>, vector<4x32xf32>
    tpu.vector_store %arg6[%c0_10, %c0_11], %6#0 {strides = array<i32>} : memref<4x32xf32, #tpu.memory_space<vmem>>, vector<4x32xf32>,
    %c0_12 = arith.constant 0 : index
    %c0_13 = arith.constant 0 : index
    %10 = vector.load %arg7[%c0_12, %c0_13] : memref<4x32xf32, #tpu.memory_space<vmem>>, vector<4x32xf32>
    tpu.vector_store %arg7[%c0_12, %c0_13], %6#1 {strides = array<i32>} : memref<4x32xf32, #tpu.memory_space<vmem>>, vector<4x32xf32>,
    return
  }
  func.func @transform_0(%arg0: i32) -> (i32, i32, i32) {
    %c0_i32 = arith.constant 0 : i32
    %c0_i32_0 = arith.constant 0 : i32
    %c0_i32_1 = arith.constant 0 : i32
    return %arg0, %c0_i32, %c0_i32_0 : i32, i32, i32
  }
  func.func @transform_1(%arg0: i32) -> (i32, i32) {
    %c0_i32 = arith.constant 0 : i32
    %c0_i32_0 = arith.constant 0 : i32
    %c0_i32_1 = arith.constant 0 : i32
    return %c0_i32, %c0_i32_0 : i32, i32
  }
  func.func @transform_2(%arg0: i32) -> (i32, i32) {
    %c0_i32 = arith.constant 0 : i32
    %c0_i32_0 = arith.constant 0 : i32
    %c0_i32_1 = arith.constant 0 : i32
    return %c0_i32, %c0_i32_0 : i32, i32
  }
  func.func @transform_3(%arg0: i32) -> (i32, i32) {
    %c0_i32 = arith.constant 0 : i32
    %c0_i32_0 = arith.constant 0 : i32
    %c0_i32_1 = arith.constant 0 : i32
    return %c0_i32, %c0_i32_0 : i32, i32
  }
  func.func @transform_4(%arg0: i32) -> (i32, i32, i32) {
    %c0_i32 = arith.constant 0 : i32
    %c0_i32_0 = arith.constant 0 : i32
    %c0_i32_1 = arith.constant 0 : i32
    return %arg0, %c0_i32, %c0_i32_0 : i32, i32, i32
  }
  func.func @transform_5(%arg0: i32) -> (i32, i32) {
    %c0_i32 = arith.constant 0 : i32
    %c0_i32_0 = arith.constant 0 : i32
    %c0_i32_1 = arith.constant 0 : i32
    return %c0_i32, %c0_i32_0 : i32, i32
  }
  func.func @transform_6(%arg0: i32) -> (i32, i32) {
    %c0_i32 = arith.constant 0 : i32
    %c0_i32_0 = arith.constant 0 : i32
    %c0_i32_1 = arith.constant 0 : i32
    return %c0_i32, %c0_i32_0 : i32, i32
  }
}

module attributes {stable_mosaic.version = 11 : i64} {
  func.func @_linear_kernel(%arg0: i32, %arg1: i32, %arg2: i32, %arg3: memref<32x32xf32, #tpu.memory_space<vmem>>, %arg4: memref<32x32xf32, #tpu.memory_space<vmem>>, %arg5: memref<1x32xf32, #tpu.memory_space<vmem>>, %arg6: memref<32x32xf32, #tpu.memory_space<vmem>>, %arg7: memref<32x32xf32, #tpu.memory_space<vmem>>) attributes {dimension_semantics = [#tpu.dimension_semantics<parallel>, #tpu.dimension_semantics<parallel>, #tpu.dimension_semantics<arbitrary>], iteration_bounds = array<i64: 1, 1, 1>, scalar_prefetch = 0 : i64, scratch_operands = 1 : i64, tpu.core_type = #tpu.core_type<tc>, window_params = [{transform_indices = @transform_0, window_bounds = array<i64: 32, 32>}, {transform_indices = @transform_1, window_bounds = array<i64: 32, 32>}, {transform_indices = @transform_2, window_bounds = array<i64: 1, 32>}, {transform_indices = @transform_3, window_bounds = array<i64: 32, 32>}]} {
    %c0_i32 = arith.constant 0 : i32
    %0 = arith.cmpi eq, %arg2, %c0_i32 : i32
    %1 = arith.extui %0 : i1 to i32
    %c0_i32_0 = arith.constant 0 : i32
    %2 = arith.cmpi ne, %1, %c0_i32_0 : i32
    scf.if %2 {
      %cst_10 = arith.constant 0.000000e+00 : f32
      %12 = vector.broadcast %cst_10 : f32 to vector<32x32xf32>
      %c0_11 = arith.constant 0 : index
      %c0_12 = arith.constant 0 : index
      %13 = vector.load %arg7[%c0_11, %c0_12] : memref<32x32xf32, #tpu.memory_space<vmem>>, vector<32x32xf32>
      tpu.vector_store %arg7[%c0_11, %c0_12], %12 {strides = array<i32>} : memref<32x32xf32, #tpu.memory_space<vmem>>, vector<32x32xf32>,
    } else {
    }
    %c0 = arith.constant 0 : index
    %c0_1 = arith.constant 0 : index
    %3 = vector.load %arg7[%c0, %c0_1] : memref<32x32xf32, #tpu.memory_space<vmem>>, vector<32x32xf32>
    %c0_2 = arith.constant 0 : index
    %c0_3 = arith.constant 0 : index
    %4 = vector.load %arg3[%c0_2, %c0_3] : memref<32x32xf32, #tpu.memory_space<vmem>>, vector<32x32xf32>
    %c0_4 = arith.constant 0 : index
    %c0_5 = arith.constant 0 : index
    %5 = vector.load %arg4[%c0_4, %c0_5] : memref<32x32xf32, #tpu.memory_space<vmem>>, vector<32x32xf32>
    %cst = arith.constant dense<0.000000e+00> : vector<32x32xf32>
    %6 = tpu.matmul %4, %5, %cst {dimension_numbers = #tpu.dot_dimension_numbers<[1], [0], [0], [1], [0, 0, 1, 1], [], []>} : vector<32x32xf32>, vector<32x32xf32>, vector<32x32xf32> -> vector<32x32xf32>
    %7 = arith.addf %3, %6 : vector<32x32xf32>
    %c0_6 = arith.constant 0 : index
    %c0_7 = arith.constant 0 : index
    %8 = vector.load %arg7[%c0_6, %c0_7] : memref<32x32xf32, #tpu.memory_space<vmem>>, vector<32x32xf32>
    tpu.vector_store %arg7[%c0_6, %c0_7], %7 {strides = array<i32>} : memref<32x32xf32, #tpu.memory_space<vmem>>, vector<32x32xf32>,
    %c0_i32_8 = arith.constant 0 : i32
    %9 = arith.cmpi eq, %arg2, %c0_i32_8 : i32
    %10 = arith.extui %9 : i1 to i32
    %c0_i32_9 = arith.constant 0 : i32
    %11 = arith.cmpi ne, %10, %c0_i32_9 : i32
    scf.if %11 {
      %c0_10 = arith.constant 0 : index
      %c0_11 = arith.constant 0 : index
      %12 = vector.load %arg7[%c0_10, %c0_11] : memref<32x32xf32, #tpu.memory_space<vmem>>, vector<32x32xf32>
      %c0_12 = arith.constant 0 : index
      %c0_13 = arith.constant 0 : index
      %13 = vector.load %arg5[%c0_12, %c0_13] : memref<1x32xf32, #tpu.memory_space<vmem>>, vector<1x32xf32>
      %14 = vector.broadcast %13 : vector<1x32xf32> to vector<32x32xf32>
      %15 = arith.addf %12, %14 : vector<32x32xf32>
      %c0_14 = arith.constant 0 : index
      %c0_15 = arith.constant 0 : index
      %16 = vector.load %arg6[%c0_14, %c0_15] : memref<32x32xf32, #tpu.memory_space<vmem>>, vector<32x32xf32>
      tpu.vector_store %arg6[%c0_14, %c0_15], %15 {strides = array<i32>} : memref<32x32xf32, #tpu.memory_space<vmem>>, vector<32x32xf32>,
    } else {
    }
    return
  }
  func.func @transform_0(%arg0: i32, %arg1: i32, %arg2: i32) -> (i32, i32) {
    %c0_i32 = arith.constant 0 : i32
    return %arg0, %arg2 : i32, i32
  }
  func.func @transform_1(%arg0: i32, %arg1: i32, %arg2: i32) -> (i32, i32) {
    %c0_i32 = arith.constant 0 : i32
    return %arg2, %arg1 : i32, i32
  }
  func.func @transform_2(%arg0: i32, %arg1: i32, %arg2: i32) -> (i32, i32) {
    %c0_i32 = arith.constant 0 : i32
    %c0_i32_0 = arith.constant 0 : i32
    return %c0_i32, %arg1 : i32, i32
  }
  func.func @transform_3(%arg0: i32, %arg1: i32, %arg2: i32) -> (i32, i32) {
    %c0_i32 = arith.constant 0 : i32
    return %arg0, %arg1 : i32, i32
  }
}

</mosaic_0001>

<bundles_post_ra>
// kernel: rnn_model_forward.5
= control target key start
LH: loop header
LB: loop body
LE: loop exit
PB: predicated region body
PF: predicated region fallthrough
CT: control target
= control target key end

     0   :  { %vm32_vm0 = vcmask 130048   ;;  %s244_s1 = inlined_call_operand.vmem [shape: f32[16,128], index: 1, kind: input, shape index: {}]   ;;  %s245_s0 = inlined_call_operand.vmem [shape: f32[32,16], index: 0, kind: input, shape index: {}]   ;;  %s246_s2 = inlined_call_operand.vmem [shape: f32[1,128], index: 2, kind: input, shape index: {}]   ;;  %s247_s3 = inlined_call_operand.vmem [shape: f32[32,128], index: 3, kind: output, shape index: {}]  }
   0x1   :  { %v30_v0 = vld [vmem:[%s244_s1] sm:$0xff]  ;;  %v31_v1 = vld [vmem:[%s244_s1 + $0x8] sm:$0xff]  ;;  %v28_v4 = vld [vmem:[%s245_s0 + $0x10] sm:$0xff] }
   0x2   :  { %v26_v2 = vld [vmem:[%s245_s0] sm:$0xff]  ;;  %v185_v3 = vpack.c.bf16 %v31_v1, %v30_v0  ;;  %182 = vmatprep.mubr.msk.f32.mxu1 %vm32_vm0, %v28_v4  ;;  %v27_v5 = vld [vmem:[%s245_s0 + $0x8] sm:$0xff]  ;;  %v29_v6 = vld [vmem:[%s245_s0 + $0x18] sm:$0xff] }
   0x3   :  { %179 = vmatprep.mubr.msk.f32.mxu0 %vm32_vm0, %v26_v2  ;;  %v168_v7 = vld [vmem:[%s246_s2] ss:$0 sm:$0xff] }
   0x4   :  { %186 = vmatprep.subr.bf16.mxu0 %v185_v3  ;;  %189 = vmatprep.subr.bf16.mxu1 %v185_v3 }
   0x5   :  { %188 = vmatpush3.bf16.msra.mxu0 %v185_v3  ;;  %190 = vmatpush3.bf16.msra.mxu1 %v185_v3 }
   0x8   :  { %180 = vmatmul.mubr.msk.f32.vlgmr.msra.gmra.mrb[0].mxu0 %vm32_vm0, %v27_v5  ;;  %183 = vmatmul.mubr.msk.f32.vlgmr.msra.gmra.mrb[0].mxu1 %vm32_vm0, %v29_v6 }
  0xdb   :  { %v181_v8 = vpop.f32.mrb[0].mxu0  ;;  %v184_v9 = vpop.f32.mrb[0].mxu1 }
  0xdc   :  { %v153_v10 = vadd.f32 %v181_v8, %v168_v7  ;;  %v155_v11 = vadd.f32 %v184_v9, %v168_v7  ;;  %v111_v12 = vpop.f32.mrb[1].mxu0  ;;  %v121_v13 = vpop.f32.mrb[1].mxu1 }
  0xdd   :  { %v152_v14 = vadd.f32 %v168_v7, %v111_v12  ;;  %v154_v15 = vadd.f32 %v168_v7, %v121_v13 }
  0xde   :  { %157 = vst [vmem:[%s247_s3 + $0x8] sm:$0xff] %v153_v10  ;;  %159 = vst [vmem:[%s247_s3 + $0x18] sm:$0xff] %v155_v11 }
  0xdf   :  { %156 = vst [vmem:[%s247_s3] sm:$0xff] %v152_v14  ;;  %158 = vst [vmem:[%s247_s3 + $0x10] sm:$0xff] %v154_v15 }

// kernel: rnn_model_forward.6
= control target key start
LH: loop header
LB: loop body
LE: loop exit
PB: predicated region body
PF: predicated region fallthrough
CT: control target
= control target key end

     0   :  { %vm25_vm0 = vcmask 257024   ;;  %s327_s25 = smov 0   ;;  %s375_s0 = inlined_call_operand.vmem [shape: f32[8,4,128], index: 0, kind: input, shape index: {}]   ;;  %s376_s1 = inlined_call_operand.vmem [shape: f32[4,32], index: 1, kind: input, shape index: {}]   ;;  %s377_s3 = inlined_call_operand.vmem [shape: f32[32,128], index: 3, kind: input, shape index: {}]   ;;  %s378_s4 = inlined_call_operand.vmem [shape: f32[8,4,32], index: 4, kind: output, shape index: {0}]   ;;  %s379_s5 = inlined_call_operand.vmem [shape: f32[4,32], index: 5, kind: output, shape index: {1}]   ;;  %s380_s6 = inlined_call_operand.vmem [shape: f32[4,32], index: 6, kind: output, shape index: {2}]   ;;  %s381_s2 = inlined_call_operand.vmem [shape: f32[4,32], index: 2, kind: input, shape index: {}]  }
   0x1   :  { %v24_v0 = vld [vmem:[%s376_s1] sm:$0xf] }
   0x2   :  { %v27_v1 = vld [vmem:[%s381_s2] sm:$0xf]  ;;  %26 = vst.msk [vmem:[#allocation2] sm:$0xf] %vm25_vm0, %v24_v0 }
   0x3   :  { %28 = vst.msk [vmem:[#allocation3] sm:$0xf] %vm25_vm0, %v27_v1 }
   0x9   :  { %v29_v2 = vld [vmem:[#allocation2] sm:$0xf]  }
   0xa   :  { %v30_v3 = vld [vmem:[#allocation3] sm:$0xf]  }
   0xb LB: > { %v42_v4 = vld [vmem:[%s377_s3] sm:$0xff]  ;;  %v43_v5 = vld [vmem:[%s377_s3 + $0x8] sm:$0xff]  ;;  %v44_v6 = vld [vmem:[%s377_s3 + $0x10] sm:$0xff]  ;;  %v274_v7 = vmov 0.0|0.0   ;;  %vm275_vm1 = vmmov 0   ;;  %v276_v10 = vmov 0.0   ;;  %s272_s25 = sphi %s327_s25, %s36_s25   ;;  %v268_v2 = vphi %v29_v2, %v383_v2   ;;  %v264_v3 = vphi %v30_v3, %v382_v3  }
   0xc   : > { %208 = vmatprep.subr.bf16.mxu0 %v274_v7  ;;  %v209_v8 = vpack.c.bf16 %v43_v5, %v42_v4  ;;  %v45_v9 = vld [vmem:[%s377_s3 + $0x18] sm:$0xff]  ;;  %205 = vmatprep.mubr.msk.f32.mxu0 %vm275_vm1, %v276_v10  ;;  %vm46_vm2 = vcmask 261120   ;;  %s190_s8 = sshll.u32 %s272_s25, 2  ;;  %s277_s12 = smov 64  }
   0xd   : > { %v212_v11 = vpack.c.bf16 %v45_v9, %v44_v6  ;;  %s40_s11 = scalar_lea.vmem %s375_s0, %s190_s8  ;;  %s278_s13 = smov 32  }
   0xe   : > { %210 = vmatpush3.bf16.msra.mxu0 %v209_v8  ;;  %v41_v12 = vld [vmem:[%s40_s11] sm:$0xf]  ;;  %s279_s14 = smov 96   ;;  %s151_s17 = scalar_lea.vmem %s378_s4, %s190_s8 }
   0xf   : > { %211 = vmatprep.subr.bf16.mxu0 %v274_v7  ;;  %s36_s25 = sadd.s32 1, %s272_s25  }
  0x10   : > { %p33_p0 = scmp.ge.s32.totalorder %s36_s25, 8  }
  0x12   : > { %213 = vmatpush3.bf16.msra.mxu0 %v212_v11 }
  0x15   : > { %206 = vmatmul.mubr.msk.f32.vlgmr.msra.gmra.mrb[0].mxu0 %vm46_vm2, %v268_v2 }
  0xe8   : > { %v116_v13 = vpop.f32.mrb[0].mxu0 }
  0xe9   : > { %v120_v14 = vadd.f32 %v116_v13, %v41_v12  ;;  %v207_v15 = vpop.f32.mrb[1].mxu0 }
  0xeb   : > { %244 = vtanh.f32 %v120_v14  ;;  %v121_v17 = vmul.f32 0.5, %v120_v14 }
  0xed   : > { %246 = vtanh.f32 %v121_v17 }
  0xf5   : > { %v245_v16 = vpop.eup %244 }
  0xf6   : > { %132 = vrot.lane.b32.xlu0 %v245_v16, %s277_s12 }
  0xf7   : > { %v247_v18 = vpop.eup %246 }
  0xf8   : > { %v123_v19 = vmul.f32 0.5, %v247_v18 }
  0xfa   : > { %127 = vrot.lane.b32.xlu0 %v264_v3, %s278_s13  ;;  %v124_v20 = vadd.f32 0.5, %v123_v19 }
 0x168   : > { %v133_v21 = vpop.permute.xlu0 %132 }
 0x169   : > { %v135_v22 = vmul.f32 %v133_v21, %v124_v20 }
 0x16b   : > { %137 = vrot.lane.b32.xlu1 %v135_v22, %s278_s13 }
 0x16c   : > { %v128_v23 = vpop.permute.xlu0 %127 }
 0x16d   : > { %v130_v24 = vmul.f32 %v128_v23, %v124_v20 }
 0x1dd   : > { %v138_v25 = vpop.permute.xlu1 %137 }
 0x1de   : > { %v140_v26 = vadd.f32 %v138_v25, %v130_v24 }
 0x1e0   : > { %248 = vtanh.f32 %v140_v26 }
 0x1ea   : > { %v249_v27 = vpop.eup %248 }
 0x1eb   : > { %143 = vrot.lane.b32.xlu1 %v249_v27, %s277_s12 }
 0x1ef   : > { %155 = vrot.lane.b32.xlu1 %v140_v26, %s279_s14 }
 0x25d   : > { %v144_v28 = vpop.permute.xlu1 %143 }
 0x25e   : > { %v146_v29 = vmul.f32 %v144_v28, %v124_v20 }
 0x260   : > { %148 = vrot.lane.b32.xlu0 %v146_v29, %s278_s13 }
 0x261   : > { %v156_v30 = vpop.permute.xlu1 %155  }
 0x262   : > { %v382_v3 = vmov %v156_v30  ;;  %160 = vst.msk [vmem:[#allocation3] sm:$0xf] (%p33_p0), %vm25_vm0, %v156_v30  ;;  %162 = vst.msk [vmem:[%s380_s6] sm:$0xf] (%p33_p0), %vm25_vm0, %v156_v30 }
 0x2cd   :  { %35 = sbr.rel (!%p33_p0) target bundleno = 11 (0xb), region = 65 }
 0x2d2   : > { %v149_v31 = vpop.permute.xlu0 %148  }
 0x2d3   : > { %153 = vst.msk [vmem:[%s151_s17] sm:$0xf] %vm25_vm0, %v149_v31  ;;  %v383_v2 = vmov %v149_v31  ;;  %159 = vst.msk [vmem:[#allocation2] sm:$0xf] (%p33_p0), %vm25_vm0, %v149_v31 }
 0x2d4   :  { %161 = vst.msk [vmem:[%s379_s5] sm:$0xf] %vm25_vm0, %v149_v31 }

// kernel: rnn_model_forward.7
= control target key start
LH: loop header
LB: loop body
LE: loop exit
PB: predicated region body
PF: predicated region fallthrough
CT: control target
= control target key end

     0   :  { %vm34_vm0 = vcmask 261120   ;;  %s268_s1 = inlined_call_operand.vmem [shape: f32[32,128], index: 1, kind: input, shape index: {}]   ;;  %s269_s0 = inlined_call_operand.vmem [shape: f32[32,32], index: 0, kind: input, shape index: {}]   ;;  %s270_s2 = inlined_call_operand.vmem [shape: f32[1,128], index: 2, kind: input, shape index: {}]   ;;  %s271_s3 = inlined_call_operand.vmem [shape: f32[32,128], index: 3, kind: output, shape index: {}]  }
   0x1   :  { %v30_v0 = vld [vmem:[%s268_s1] sm:$0xff]  ;;  %v31_v1 = vld [vmem:[%s268_s1 + $0x8] sm:$0xff]  ;;  %v32_v2 = vld [vmem:[%s268_s1 + $0x10] sm:$0xff] }
   0x2   :  { %v193_v3 = vpack.c.bf16 %v31_v1, %v30_v0  ;;  %v33_v4 = vld [vmem:[%s268_s1 + $0x18] sm:$0xff]  ;;  %v26_v5 = vld [vmem:[%s269_s0] sm:$0xff]  ;;  %v28_v6 = vld [vmem:[%s269_s0 + $0x10] sm:$0xff] }
   0x3   :  { %v197_v7 = vpack.c.bf16 %v33_v4, %v32_v2  ;;  %187 = vmatprep.mubr.msk.f32.mxu0 %vm34_vm0, %v26_v5  ;;  %190 = vmatprep.mubr.msk.f32.mxu1 %vm34_vm0, %v28_v6  ;;  %v27_v8 = vld [vmem:[%s269_s0 + $0x8] sm:$0xff]  ;;  %v29_v9 = vld [vmem:[%s269_s0 + $0x18] sm:$0xff]  ;;  %v170_v10 = vld [vmem:[%s270_s2] ss:$0 sm:$0xff] }
   0x4   :  { %194 = vmatprep.subr.bf16.mxu0 %v193_v3  ;;  %201 = vmatprep.subr.bf16.mxu1 %v193_v3 }
   0x5   :  { %196 = vmatpush3.bf16.msra.mxu0 %v193_v3  ;;  %203 = vmatpush3.bf16.msra.mxu1 %v193_v3 }
   0x6   :  { %198 = vmatprep.subr.bf16.mxu0 %v197_v7  ;;  %202 = vmatprep.subr.bf16.mxu1 %v197_v7 }
   0x9   :  { %200 = vmatpush3.bf16.msra.mxu0 %v197_v7  ;;  %204 = vmatpush3.bf16.msra.mxu1 %v197_v7 }
   0xc   :  { %188 = vmatmul.mubr.msk.f32.vlgmr.msra.gmra.mrb[0].mxu0 %vm34_vm0, %v27_v8  ;;  %191 = vmatmul.mubr.msk.f32.vlgmr.msra.gmra.mrb[0].mxu1 %vm34_vm0, %v29_v9 }
  0xdf   :  { %v189_v11 = vpop.f32.mrb[0].mxu0  ;;  %v192_v12 = vpop.f32.mrb[0].mxu1 }
  0xe0   :  { %v155_v13 = vadd.f32 %v189_v11, %v170_v10  ;;  %v157_v14 = vadd.f32 %v192_v12, %v170_v10  ;;  %v113_v15 = vpop.f32.mrb[1].mxu0  ;;  %v123_v16 = vpop.f32.mrb[1].mxu1 }
  0xe1   :  { %v154_v17 = vadd.f32 %v170_v10, %v113_v15  ;;  %v156_v18 = vadd.f32 %v170_v10, %v123_v16 }
  0xe2   :  { %159 = vst [vmem:[%s271_s3 + $0x8] sm:$0xff] %v155_v13  ;;  %161 = vst [vmem:[%s271_s3 + $0x18] sm:$0xff] %v157_v14 }
  0xe3   :  { %158 = vst [vmem:[%s271_s3] sm:$0xff] %v154_v17  ;;  %160 = vst [vmem:[%s271_s3 + $0x10] sm:$0xff] %v156_v18 }

// kernel: rnn_model_forward.9
= control target key start
LH: loop header
LB: loop body
LE: loop exit
PB: predicated region body
PF: predicated region fallthrough
CT: control target
= control target key end

     0   :  { %vm19_vm0 = vcmask 261120   ;;  %v247_v7 = vmov 0.0   ;;  %s326_s0 = inlined_call_operand.vmem [shape: f32[32,32], index: 0, kind: input, shape index: {}]   ;;  %s327_s1 = inlined_call_operand.vmem [shape: f32[32,32], index: 1, kind: input, shape index: {}]   ;;  %s328_s2 = inlined_call_operand.vmem [shape: f32[1,32], index: 2, kind: input, shape index: {}]   ;;  %s329_s3 = inlined_call_operand.hbm [shape: f32[32,32], index: 3, kind: output, shape index: {}]  }
   0x1   :  { %v32_v0 = vld [vmem:[%s327_s1] sm:$0xff]  ;;  %v33_v1 = vld [vmem:[%s327_s1 + $0x8] sm:$0xff]  ;;  %v34_v2 = vld [vmem:[%s327_s1 + $0x10] sm:$0xff]  ;;  %21 = vst.msk [vmem:[#allocation2 + $0x8] sm:$0xff] %vm19_vm0, %v247_v7 }
   0x2   :  { %v207_v3 = vpack.c.bf16 %v33_v1, %v32_v0  ;;  %v35_v4 = vld [vmem:[%s327_s1 + $0x18] sm:$0xff]  ;;  %v28_v5 = vld [vmem:[%s326_s0] sm:$0xff]  ;;  %v30_v6 = vld [vmem:[%s326_s0 + $0x10] sm:$0xff]  ;;  %20 = vst.msk [vmem:[#allocation2] sm:$0xff] %vm19_vm0, %v247_v7 }
   0x3   :  { %22 = vst.msk [vmem:[#allocation2 + $0x10] sm:$0xff] %vm19_vm0, %v247_v7  ;;  %23 = vst.msk [vmem:[#allocation2 + $0x18] sm:$0xff] %vm19_vm0, %v247_v7  ;;  %v211_v8 = vpack.c.bf16 %v35_v4, %v34_v2  ;;  %201 = vmatprep.mubr.msk.f32.mxu0 %vm19_vm0, %v28_v5  ;;  %204 = vmatprep.mubr.msk.f32.mxu1 %vm19_vm0, %v30_v6 }
   0x4   :  { %8 = vsyncpa [#allocation4], 0  ;;  %208 = vmatprep.subr.bf16.mxu0 %v207_v3  ;;  %215 = vmatprep.subr.bf16.mxu1 %v207_v3  ;;  %v29_v9 = vld [vmem:[%s326_s0 + $0x8] sm:$0xff]  ;;  %v31_v10 = vld [vmem:[%s326_s0 + $0x18] sm:$0xff]  ;;  %s248_s28 = smov [#allocation3]  }
   0x5   :  { %210 = vmatpush3.bf16.msra.mxu0 %v207_v3  ;;  %217 = vmatpush3.bf16.msra.mxu1 %v207_v3  ;;  %v184_v23 = vld [vmem:[%s328_s2] ss:$0 sm:$0xff]  ;;  %s169_s29 = sshll.u32 %s248_s28, 4  ;;  %s170_s29 = int_to_ptr.vmem [resolvable:$true] %s169_s29 }
   0x6   :  { %212 = vmatprep.subr.bf16.mxu0 %v211_v8  ;;  %216 = vmatprep.subr.bf16.mxu1 %v211_v8  ;;  %s223_s2 = scalar_lea.vmem %s170_s29, 512  ;;  %p228_p1 = scmp.lt.s32.totalorder %s170_s29, %s170_s29 }
   0x7   :  { %p224_p0 = scmp.ne.s32.totalorder %s170_s29, %s223_s2  ;;  %p229_p2 = scmp.lt.s32.totalorder %s223_s2, %s223_s2 }
   0x8   :  { %v25_v11 = vld [vmem:[#allocation2 + $0x8] sm:$0xff] }
   0x9   :  { %214 = vmatpush3.bf16.msra.mxu0 %v211_v8  ;;  %218 = vmatpush3.bf16.msra.mxu1 %v211_v8  ;;  %v24_v13 = vld [vmem:[#allocation2] sm:$0xff]  ;;  %p230_p3 = por %p229_p2, %p228_p1 }
   0xa   :  { %v27_v12 = vld [vmem:[#allocation2 + $0x18] sm:$0xff]  ;;  %v26_v14 = vld [vmem:[#allocation2 + $0x10] sm:$0xff] }
   0xb   :  { %p231_p4 = pnand %p230_p3, %p224_p0 }
   0xc   :  { %202 = vmatmul.mubr.msk.f32.vlgmr.msra.gmra.mrb[0].mxu0 %vm19_vm0, %v29_v9  ;;  %205 = vmatmul.mubr.msk.f32.vlgmr.msra.gmra.mrb[0].mxu1 %vm19_vm0, %v31_v10 }
  0xdf   :  { %v203_v15 = vpop.f32.mrb[0].mxu0  ;;  %v206_v16 = vpop.f32.mrb[0].mxu1 }
  0xe0   :  { %v135_v17 = vadd.f32 %v203_v15, %v25_v11  ;;  %v137_v18 = vadd.f32 %v206_v16, %v27_v12  ;;  %v115_v19 = vpop.f32.mrb[1].mxu0  ;;  %v125_v20 = vpop.f32.mrb[1].mxu1 }
  0xe1   :  { %v134_v21 = vadd.f32 %v115_v19, %v24_v13  ;;  %v136_v22 = vadd.f32 %v125_v20, %v26_v14 }
  0xe2   :  { %139 = vst.msk [vmem:[#allocation2 + $0x8] sm:$0xff] %vm19_vm0, %v135_v17  ;;  %141 = vst.msk [vmem:[#allocation2 + $0x18] sm:$0xff] %vm19_vm0, %v137_v18 }
  0xe3   :  { %138 = vst.msk [vmem:[#allocation2] sm:$0xff] %vm19_vm0, %v134_v21  ;;  %140 = vst.msk [vmem:[#allocation2 + $0x10] sm:$0xff] %vm19_vm0, %v136_v22 }
  0xe9   :  { %v146_v24 = vld [vmem:[#allocation2 + $0x8] sm:$0xff]  ;;  %v148_v25 = vld [vmem:[#allocation2 + $0x18] sm:$0xff] }
  0xea   :  { %v145_v26 = vld [vmem:[#allocation2] sm:$0xff]  ;;  %v147_v27 = vld [vmem:[#allocation2 + $0x10] sm:$0xff]  ;;  %v157_v28 = vadd.f32 %v184_v23, %v146_v24  ;;  %v159_v29 = vadd.f32 %v184_v23, %v148_v25 }
  0xeb   :  { %v156_v30 = vadd.f32 %v184_v23, %v145_v26  ;;  %v158_v31 = vadd.f32 %v184_v23, %v147_v27 }
  0xec   :  { %161 = vst.msk [vmem:[#allocation3 + $0x8] sm:$0xff] %vm19_vm0, %v157_v28  ;;  %163 = vst.msk [vmem:[#allocation3 + $0x18] sm:$0xff] %vm19_vm0, %v159_v29 }
  0xed   :  { %160 = vst.msk [vmem:[#allocation3] sm:$0xff] %vm19_vm0, %v156_v30  ;;  %162 = vst.msk [vmem:[#allocation3 + $0x10] sm:$0xff] %vm19_vm0, %v158_v31 }
  0xee   :  { %234 = shalt.err (!%p231_p4)
}
  0xef   :  { %s235_s5 = scalar_lea.hbm %s329_s3, 512 }
  0xf0   :  { %p236_p5 = scmp.ne.s32.totalorder %s329_s3, %s235_s5  ;;  %p239_p6 = scmp.lt.u32.totalorder %s235_s5, %s329_s3 }
  0xf2   :  { %p241_p7 = pnand %p239_p6, %p236_p5 }
  0xf4   :  { %244 = shalt.err (!%p241_p7)
}
  0xf5   :  { %s249_s10 = smov 128   ;;  %s250_s11 = smov 8  }
  0xf6   :  { %175 = dma.vmem_to_hbm [thread:$0]  %s170_s29, 512, %s329_s3, [#allocation4], %s249_s10, %s249_s10, %s250_s11  }
  0xf7   :  { %245 = dma.done.wait [#allocation4], 512  }
  0xf8   :  { %246 = vsyncadd [#allocation4], 4294966784 }
  0xf9   :  { %179 = vsyncpa [#allocation4], 1 }

</bundles_post_ra>
